<compile_context>
chip_gen: v6e
topology: v6e:2x2x1
jax: 0.10.0
libtpu: 0.0.40
codegen_flags: <defaults>
</compile_context>

<pallas_src>
import functools

import jax
import jax.numpy as jnp
from jax.experimental import pallas as pl
from jax.experimental.pallas import tpu as pltpu


def _conv1x1_kernel(x_ref, w_ref, b_ref, o_ref):
    # x_ref: (C_in, T)   w_ref: (C_out, C_in)   b_ref: (C_out, 1) f32
    # o_ref: (C_out, T)  -- spatial on the lane axis -> dense stores.
    acc = jnp.dot(w_ref[...], x_ref[...], preferred_element_type=jnp.float32)
    o_ref[...] = (acc + b_ref[...]).astype(o_ref.dtype)


def _pick_spatial_tile(hw, c_in, c_out, in_bytes, out_bytes,
                       t_max=2048, vmem_block_budget=24 * 1024 * 1024):
    """Largest multiple-of-128 spatial tile whose double-buffered blocks fit
    the VMEM block budget (safe on v7x's 64 MiB VMEM); never larger than the
    lane-padded spatial extent."""
    hw_lanes = pl.cdiv(hw, 128) * 128
    t = max(128, (min(t_max, hw_lanes) // 128) * 128)
    per_col = 2 * (c_in * in_bytes + c_out * out_bytes)    # dbl-buffered x + out
    fixed = 2 * (c_out * c_in * in_bytes + c_out * 4)      # weight + f32 bias
    while t > 128 and fixed + per_col * t > vmem_block_budget:
        t -= 128
    return t


@functools.partial(jax.jit, static_argnames=("t_hw", "compute_dtype"))
def linear_1x1_conv(x_nchw, weight, bias, *, t_hw=None, compute_dtype=None):
    """1x1 Conv2d forward (Graph-WaveNet `linear`).

    x_nchw: (B, C_in, H, W)   weight: (C_out, C_in, 1, 1)   bias: (C_out,)
    returns (B, C_out, H, W) in x_nchw.dtype.
    compute_dtype: optional (e.g. jnp.bfloat16) -- cast x/weight for the
        kernel; accumulation stays f32, output stays x.dtype.
    """
    B, C_in, H, W = x_nchw.shape
    C_out = weight.shape[0]
    HW = H * W
    out_dtype = x_nchw.dtype
    cdt = out_dtype if compute_dtype is None else jnp.dtype(compute_dtype)

    # Free reshapes only (no transposes, no HBM round-trips).
    x3 = x_nchw.reshape(B, C_in, HW).astype(cdt)
    w_mat = weight.reshape(C_out, C_in).astype(cdt)
    b_mat = bias.reshape(C_out, 1).astype(jnp.float32)

    in_bytes = jnp.dtype(cdt).itemsize
    out_bytes = jnp.dtype(out_dtype).itemsize
    t = t_hw if t_hw is not None else _pick_spatial_tile(
        HW, C_in, C_out, in_bytes, out_bytes)

    grid = (B, pl.cdiv(HW, t))   # ragged last tile handled by Pallas; no pad

    out3 = pl.pallas_call(
        _conv1x1_kernel,
        out_shape=jax.ShapeDtypeStruct((B, C_out, HW), out_dtype),
        grid_spec=pltpu.PrefetchScalarGridSpec(
            num_scalar_prefetch=0,
            grid=grid,
            in_specs=[
                pl.BlockSpec((None, C_in, t), lambda b, j: (b, 0, j)),
                pl.BlockSpec((C_out, C_in), lambda b, j: (0, 0)),
                pl.BlockSpec((C_out, 1), lambda b, j: (0, 0)),
            ],
            out_specs=pl.BlockSpec((None, C_out, t), lambda b, j: (b, 0, j)),
        ),
        compiler_params=pltpu.CompilerParams(
            dimension_semantics=("parallel", "parallel"),
            # Above v5e/v6e scoped defaults (16/32 MiB), under v7x physical
            # 64 MiB; tile picker keeps double-buffered blocks <= 24 MiB.
            vmem_limit_bytes=48 * 1024 * 1024,
        ),
    )(x3, w_mat, b_mat)

    return out3.reshape(B, C_out, H, W)


def init_params(key, c_in, c_out, dtype=jnp.float32):
    # Deterministic init mimicking PyTorch Conv2d default (uniform +/- 1/sqrt(fan_in)).
    kw, kb = jax.random.split(key)
    bound = 1.0 / jnp.sqrt(jnp.asarray(c_in, dtype=jnp.float32))
    weight = jax.random.uniform(kw, (c_out, c_in, 1, 1), dtype, -bound, bound)
    bias = jax.random.uniform(kb, (c_out,), dtype, -bound, bound)
    return weight, bias


def _reference(x, weight, bias):
    c_out, c_in = weight.shape[0], weight.shape[1]
    return (jnp.einsum("bchw,oc->bohw", x, weight.reshape(c_out, c_in))
            + bias[None, :, None, None])


if __name__ == "__main__":
    key = jax.random.PRNGKey(0)
    k_x, k_p, k_x2, k_p2 = jax.random.split(key, 4)

    # Case 1: start_conv-like shape, lane-aligned spatial extent (H*W = 256).
    B, C_in, C_out, H, W = 2, 4, 8, 16, 16
    x = jax.random.normal(k_x, (B, C_in, H, W), dtype=jnp.float32)
    weight, bias = init_params(k_p, C_in, C_out)
    out = linear_1x1_conv(x, weight, bias)
    jax.block_until_ready(out)
    ref = _reference(x, weight, bias)
    assert out.shape == (B, C_out, H, W)
    assert jnp.allclose(out, ref, atol=1e-5, rtol=1e-5)

    # Case 2: ragged spatial extent (H*W = 156, not a multiple of 128).
    B2, C_in2, C_out2, H2, W2 = 2, 32, 32, 13, 12
    x2 = jax.random.normal(k_x2, (B2, C_in2, H2, W2), dtype=jnp.float32)
    w2, b2 = init_params(k_p2, C_in2, C_out2)
    out2 = linear_1x1_conv(x2, w2, b2)
    jax.block_until_ready(out2)
    ref2 = _reference(x2, w2, b2)
    assert out2.shape == (B2, C_out2, H2, W2)
    assert jnp.allclose(out2, ref2, atol=1e-5, rtol=1e-5)

    # Case 3: bf16 compute path (f32 accumulation, output in caller dtype).
    out_bf16 = linear_1x1_conv(x2, w2, b2, compute_dtype=jnp.bfloat16)
    jax.block_until_ready(out_bf16)
    assert out_bf16.dtype == x2.dtype
    assert jnp.allclose(out_bf16, ref2, atol=5e-2, rtol=5e-2)

    print("KERNEL_OK")
</pallas_src>

<mosaic_0001>
module attributes {stable_mosaic.version = 11 : i64} {
  func.func @_conv1x1_kernel(%arg0: i32, %arg1: i32, %arg2: memref<1x4x256xf32, #tpu.memory_space<vmem>>, %arg3: memref<8x4xf32, #tpu.memory_space<vmem>>, %arg4: memref<8x1xf32, #tpu.memory_space<vmem>>, %arg5: memref<1x8x256xf32, #tpu.memory_space<vmem>>) attributes {dimension_semantics = [#tpu.dimension_semantics<parallel>, #tpu.dimension_semantics<parallel>], iteration_bounds = array<i64: 2, 1>, scalar_prefetch = 0 : i64, scratch_operands = 0 : i64, tpu.core_type = #tpu.core_type<tc>, window_params = [{transform_indices = @transform_0, window_bounds = array<i64: 1, 4, 256>}, {pipeline_mode = #tpu.pipeline_mode<synchronous>, transform_indices = @transform_1, window_bounds = array<i64: 8, 4>}, {pipeline_mode = #tpu.pipeline_mode<synchronous>, transform_indices = @transform_2, window_bounds = array<i64: 8, 1>}, {transform_indices = @transform_3, window_bounds = array<i64: 1, 8, 256>}]} {
    %c0 = arith.constant 0 : index
    %c0_0 = arith.constant 0 : index
    %0 = vector.load %arg3[%c0, %c0_0] : memref<8x4xf32, #tpu.memory_space<vmem>>, vector<8x4xf32>
    %c0_1 = arith.constant 0 : index
    %c0_2 = arith.constant 0 : index
    %c0_3 = arith.constant 0 : index
    %1 = vector.load %arg2[%c0_1, %c0_2, %c0_3] : memref<1x4x256xf32, #tpu.memory_space<vmem>>, vector<1x4x256xf32>
    %2 = vector.shape_cast %1 : vector<1x4x256xf32> to vector<4x256xf32>
    %cst = arith.constant dense<0.000000e+00> : vector<8x256xf32>
    %3 = tpu.matmul %0, %2, %cst {dimension_numbers = #tpu.dot_dimension_numbers<[1], [0], [0], [1], [0, 0, 1, 1], [], []>} : vector<8x4xf32>, vector<4x256xf32>, vector<8x256xf32> -> vector<8x256xf32>
    %c0_4 = arith.constant 0 : index
    %c0_5 = arith.constant 0 : index
    %4 = vector.load %arg4[%c0_4, %c0_5] : memref<8x1xf32, #tpu.memory_space<vmem>>, vector<8x1xf32>
    %5 = vector.broadcast %4 : vector<8x1xf32> to vector<8x256xf32>
    %6 = arith.addf %3, %5 : vector<8x256xf32>
    %c0_6 = arith.constant 0 : index
    %c0_7 = arith.constant 0 : index
    %c0_8 = arith.constant 0 : index
    %7 = vector.load %arg5[%c0_6, %c0_7, %c0_8] : memref<1x8x256xf32, #tpu.memory_space<vmem>>, vector<1x8x256xf32>
    %8 = vector.shape_cast %7 : vector<1x8x256xf32> to vector<8x256xf32>
    %9 = vector.shape_cast %6 : vector<8x256xf32> to vector<1x8x256xf32>
    tpu.vector_store %arg5[%c0_6, %c0_7, %c0_8], %9 {strides = array<i32>} : memref<1x8x256xf32, #tpu.memory_space<vmem>>, vector<1x8x256xf32>,
    return
  }
  func.func @transform_0(%arg0: i32, %arg1: i32) -> (i32, i32, i32) {
    %c0_i32 = arith.constant 0 : i32
    %c0_i32_0 = arith.constant 0 : i32
    return %arg0, %c0_i32, %arg1 : i32, i32, i32
  }
  func.func @transform_1(%arg0: i32, %arg1: i32) -> (i32, i32) {
    %c0_i32 = arith.constant 0 : i32
    %c0_i32_0 = arith.constant 0 : i32
    %c0_i32_1 = arith.constant 0 : i32
    return %c0_i32, %c0_i32_0 : i32, i32
  }
  func.func @transform_2(%arg0: i32, %arg1: i32) -> (i32, i32) {
    %c0_i32 = arith.constant 0 : i32
    %c0_i32_0 = arith.constant 0 : i32
    %c0_i32_1 = arith.constant 0 : i32
    return %c0_i32, %c0_i32_0 : i32, i32
  }
  func.func @transform_3(%arg0: i32, %arg1: i32) -> (i32, i32, i32) {
    %c0_i32 = arith.constant 0 : i32
    %c0_i32_0 = arith.constant 0 : i32
    return %arg0, %c0_i32, %arg1 : i32, i32, i32
  }
}

</mosaic_0001>

<bundles_post_ra>
// kernel: linear_1x1_conv.1
= control target key start
LH: loop header
LB: loop body
LE: loop exit
PB: predicated region body
PF: predicated region fallthrough
CT: control target
= control target key end

     0   :  { %s479_s12 = smov 0   ;;  %s481_s13 = smov 0   ;;  %s518_s0 = inlined_call_operand.vmem [shape: f32[2,4,256], index: 0, kind: input, shape index: {}]   ;;  %s519_s1 = inlined_call_operand.vmem [shape: f32[8,4], index: 1, kind: input, shape index: {}]   ;;  %s520_s2 = inlined_call_operand.vmem [shape: f32[8,1], index: 2, kind: input, shape index: {}]   ;;  %s521_s3 = inlined_call_operand.vmem [shape: f32[2,8,256], index: 3, kind: output, shape index: {}]  }
   0x1   :  { %s483_s14 = smov 0  }
   0x2 LB: > { %s25_s15 = sadd.s32 1, %s451_s13  ;;  %p393_p0 = scmp.ge.s32.totalorder %s455_s14, 1  ;;  %s455_s14 = sphi %s483_s14, %s13_s14   ;;  %s451_s13 = sphi %s481_s13, %s523_s13   ;;  %s447_s12 = sphi %s479_s12, %s522_s12  }
   0x3   : > { %p27_p1 = scmp.ge.s32.totalorder %s25_s15, 2  ;;  %p158_p2 = scmp.lt.s32.totalorder %s455_s14, 3 }
   0x5   : > { %s525_s15 = smov (%p27_p1, %s25_s15), 0  ;;  %p159_p3 = pnand %p393_p0, %p158_p2 }
   0x6   : > { %p191_p4 = scmp.lt.s32.totalorder (!%p159_p3), %s447_s12, 1 }
   0x7   : > { %162 = sbr.rel (%p159_p3) target bundleno = 218 (0xda), region = 32 }
   0xc   : > { %v457_v0 = vmov 0.0   ;;  %v458_v1 = vmov 0   ;;  %v212_v2 = vld [vmem:[%s520_s2] sm:$0xff]  ;;  %s527_s12 = smov (!%p191_p4, %s447_s12), 1  ;;  %vm224_vm0 = vcmask 1043456   ;;  %vm220_vm1 = vcmask 31744  }
   0xd   : > { %293 = vmatprep.mubr.f32.mxu0 %v457_v0  ;;  %431 = vset.pattern.permute.xlu0 %v458_v1  ;;  %s403_s18 = sshll.u32 %s527_s12, 3  ;;  %v210_v5 = vld [vmem:[%s519_s1] sm:$0xff]  ;;  %s404_s24 = sshll.u32 %s527_s12, 4 }
   0xe   : > { %215 = vperm.xlu0 %431, %v212_v2   ;;  %s198_s21 = scalar_lea.vmem %s518_s0, %s403_s18  ;;  %s208_s27 = scalar_lea.vmem %s521_s3, %s404_s24 }
   0xf   : > { %v211_v3 = vld [vmem:[%s198_s21] sm:$0xff] }
  0x10   : > { %v219_v4 = vcombine.high %v211_v3, %v211_v3 }
  0x12   : > { %398 = vmatprep.subr.msk.mxu0 %vm224_vm0, %v219_v4 }
  0x13   : > { %399 = vmatpush1.msk.msra.mxu0 %vm224_vm0, %v211_v3 }
  0x14   : > { %400 = vmatmul.mubr.msk.f32.vlgmr.msra.gmra.mxu0 %vm220_vm1, %v210_v5 }
  0x89   : > { %v216_v6 = vpop.permute.xlu0 %215 }
  0xd4   : > { %v295_v7 = vpop.f32.mrf.mxu0 }
  0xd5   : > { %v296_v8 = vadd.f32 %v295_v7, %v216_v6 }
  0xd6   : > { %v297_v9 = vpop.f32.mrf.mxu0 }
  0xd7   : > { %300 = vst [vmem:[%s208_s27] sm:$0xff] %v296_v8  ;;  %v298_v10 = vadd.f32 %v297_v9, %v216_v6 }
  0xd9   : > { %301 = vst [vmem:[%s208_s27 + $0x8] sm:$0xff] %v298_v10 }
  0xda PF: > { %s13_s14 = sadd.s32 1, %s455_s14   ;;  %s522_s12 = smov %s451_s13 }
  0xdb   : > { %p10_p5 = scmp.ge.s32.totalorder %s13_s14, 4   ;;  %s523_s13 = smov %s525_s15 }
  0xdd   :  { %12 = sbr.rel (!%p10_p5) target bundleno = 2 (0x2), region = 62 }

</bundles_post_ra>
